<compile_context>
chip_gen: v7x
topology: tpu7x:2x2x1
jax: 0.10.0
libtpu: 0.0.40
codegen_flags: <defaults>
</compile_context>

<pallas_src>
import functools

import jax
import jax.numpy as jnp
from jax.experimental import pallas as pl
from jax.experimental.pallas import tpu as pltpu


def _round_up(n, m):
    return ((n + m - 1) // m) * m


# ---------------------------------------------------------------------------
# Pallas kernel: single packed conv-stem matmul + SiLU + per-image global mean
# pool + fc head as a lane reduction.
# ---------------------------------------------------------------------------
def _make_disc_kernel(b_blk, hw, inv_hw):
    def disc_kernel(x_ref, w_ref, bconv_ref, wfc_ref, bfc_ref, out_ref):
        # x_ref    : (b_blk*hw, K) bf16 -- im2col patches for b_blk images
        # w_ref    : (K, Cf_pad) bf16   -- conv stem weights, 9 taps packed into K
        # bconv_ref: (1, Cf_pad) f32
        # wfc_ref  : (1, Cf_pad) f32
        # bfc_ref  : (1, 1) f32 in SMEM
        # out_ref  : (1, b_blk, 1) f32  -- per-step logits block

        # One packed MXU matmul (K = 9*Cin), f32 accumulation; result is an SSA
        # value -- no VMEM accumulator round-trips.
        feat = jnp.dot(x_ref[...], w_ref[...],
                       preferred_element_type=jnp.float32)      # (b_blk*hw, Cf_pad)
        feat = feat + bconv_ref[...]
        feat = feat * jax.nn.sigmoid(feat)                       # SiLU (EUP + VPU)

        # Global average pool over H, W (== .mean([2, 3])): split the batch off
        # the sublane axis (hw is a multiple of 8, so this is a cheap view) and
        # do a cross-sublane (XLU) sum.
        feat = feat.reshape(b_blk, hw, feat.shape[-1])
        pooled = jnp.sum(feat, axis=1) * inv_hw                  # (b_blk, Cf_pad)

        # fc head Linear(num_features, 1) as a lane reduction (VPU/XLU), not a
        # 1-wide-output MXU matmul. Padded feature lanes carry zero weight.
        y = jnp.sum(pooled * wfc_ref[...], axis=1, keepdims=True)  # (b_blk, 1)
        out_ref[0] = (y + bfc_ref[0, 0]).astype(out_ref.dtype)

    return disc_kernel


# ---------------------------------------------------------------------------
# Wrapper: layout plumbing only (im2col / pad / transpose / bf16 cast) + pallas_call
# ---------------------------------------------------------------------------
@functools.partial(jax.jit, static_argnames=("b_blk",))
def discriminator_forward(x, w_conv, b_conv, w_fc, b_fc, *, b_blk=None):
    """x: (B, Cin, H, W) NCHW. w_conv: (Cf, Cin, 3, 3) (PyTorch OIHW).
    b_conv: (Cf,). w_fc: (Cf, 1). b_fc: (1, 1). Returns logits (B, 1)."""
    B, C, H, W = x.shape
    Cf = w_conv.shape[0]
    HW = H * W
    K = 9 * C
    Cf_pad = _round_up(Cf, 128)                         # lane-dense feature dim

    # Images per grid step: fat blocks for single-TC v5e/v6e, but keep >= 2 grid
    # steps so the "parallel" batch axis still splits across v7x's two TCs.
    if b_blk is None:
        b_blk = B // 2 if (B % 2 == 0 and B >= 2) else 1
    assert B % b_blk == 0, (B, b_blk)
    assert HW % 8 == 0, HW                              # cheap sublane split in-kernel
    G = B // b_blk

    # ---- wrapper-side im2col: bf16 once, exact 3x3 'same' patches -------------
    xp = jnp.pad(x, ((0, 0), (0, 0), (1, 1), (1, 1)))   # zero halo == padding=1
    taps = [xp[:, :, di:di + H, dj:dj + W] for di in range(3) for dj in range(3)]
    pat = jnp.stack(taps, axis=1)                       # (B, 9, C, H, W)
    pat = jnp.transpose(pat, (0, 3, 4, 1, 2))           # (B, H, W, 9, C)
    patches = pat.reshape(G, b_blk * HW, K).astype(jnp.bfloat16)

    # Conv weights OIHW -> (9*Cin, Cf_pad) with (kh, kw, cin) row order, matching
    # the patch layout; bf16 feed for the MXU, zero-padded feature lanes.
    w_pack = jnp.transpose(w_conv, (2, 3, 1, 0)).reshape(K, Cf)
    w_pack = jnp.pad(w_pack, ((0, 0), (0, Cf_pad - Cf))).astype(jnp.bfloat16)

    b_conv_row = jnp.pad(b_conv.reshape(1, Cf).astype(jnp.float32),
                         ((0, 0), (0, Cf_pad - Cf)))
    w_fc_row = jnp.pad(jnp.transpose(w_fc.astype(jnp.float32)),
                       ((0, 0), (0, Cf_pad - Cf)))      # (1, Cf_pad)
    b_fc_smem = b_fc.reshape(1, 1).astype(jnp.float32)

    kernel = _make_disc_kernel(b_blk, HW, 1.0 / HW)

    cost = pl.CostEstimate(
        flops=2 * B * HW * K * Cf_pad + 6 * B * HW * Cf_pad + 2 * B * Cf_pad,
        transcendentals=B * HW * Cf_pad,
        bytes_accessed=(patches.size * 2 + w_pack.size * 2
                        + (b_conv_row.size + w_fc_row.size + b_fc_smem.size) * 4
                        + B * 4),
    )

    out = pl.pallas_call(
        kernel,
        out_shape=jax.ShapeDtypeStruct((G, b_blk, 1), jnp.float32),
        grid=(G,),
        in_specs=[
            pl.BlockSpec((pl.Squeezed(), b_blk * HW, K), lambda g: (g, 0, 0)),
            pl.BlockSpec((K, Cf_pad), lambda g: (0, 0)),
            pl.BlockSpec((1, Cf_pad), lambda g: (0, 0)),
            pl.BlockSpec((1, Cf_pad), lambda g: (0, 0)),
            pl.BlockSpec(memory_space=pltpu.MemorySpace.SMEM),
        ],
        out_specs=pl.BlockSpec((1, b_blk, 1), lambda g: (g, 0, 0)),
        compiler_params=pltpu.CompilerParams(
            dimension_semantics=("parallel",)),
        cost_estimate=cost,
    )(patches, w_pack, b_conv_row, w_fc_row, b_fc_smem)

    return out.reshape(B, 1)


# ---------------------------------------------------------------------------
# Pure-JAX reference (same math, no Pallas, f32 conv) for a correctness check
# ---------------------------------------------------------------------------
def discriminator_ref(x, w_conv, b_conv, w_fc, b_fc):
    feat = jax.lax.conv_general_dilated(
        x, w_conv, window_strides=(1, 1), padding=((1, 1), (1, 1)),
        dimension_numbers=("NCHW", "OIHW", "NCHW"))
    feat = feat + b_conv.reshape(1, -1, 1, 1)
    feat = feat * jax.nn.sigmoid(feat)                   # SiLU
    pooled = feat.mean(axis=(2, 3))                      # (B, Cf)
    return pooled @ w_fc + b_fc                          # (B, 1)


if __name__ == "__main__":
    key = jax.random.PRNGKey(0)
    k_x, k_wc, k_bc, k_wf, k_bf = jax.random.split(key, 5)

    # Small shapes consistent with the module's forward (NCHW input). B=4 so the
    # batched-per-step path (b_blk=2, 2 parallel grid steps) is exercised.
    B, C_in, H, W = 4, 4, 16, 16
    C_feat = 32                       # stand-in for EfficientNet num_features
    KH = KW = 3

    x = jax.random.normal(k_x, (B, C_in, H, W), dtype=jnp.float32)

    # Deterministic params (PyTorch layouts).
    w_conv = jax.random.normal(k_wc, (C_feat, C_in, KH, KW), jnp.float32) * 0.1
    b_conv = jax.random.normal(k_bc, (C_feat,), jnp.float32) * 0.01
    w_fc = jax.random.normal(k_wf, (C_feat, 1), jnp.float32) * 0.1
    b_fc = jax.random.normal(k_bf, (1, 1), jnp.float32) * 0.01

    out = discriminator_forward(x, w_conv, b_conv, w_fc, b_fc)
    out = jax.block_until_ready(out)

    ref = discriminator_ref(x, w_conv, b_conv, w_fc, b_fc)
    assert out.shape == (B, 1), out.shape
    # bf16 MXU feed vs f32 reference -> loose tolerance (intentional tradeoff).
    assert jnp.allclose(out, ref, atol=1e-2, rtol=1e-2), (out, ref)

    print("KERNEL_OK")
</pallas_src>

<mosaic_0001>
module attributes {stable_mosaic.version = 11 : i64} {
  func.func @disc_kernel(%arg0: i32, %arg1: memref<1x512x36xbf16, #tpu.memory_space<vmem>>, %arg2: memref<36x128xbf16, #tpu.memory_space<vmem>>, %arg3: memref<1x128xf32, #tpu.memory_space<vmem>>, %arg4: memref<1x128xf32, #tpu.memory_space<vmem>>, %arg5: memref<1x1xf32, #tpu.memory_space<smem>>, %arg6: memref<1x2x1xf32, #tpu.memory_space<vmem>>) attributes {dimension_semantics = [#tpu.dimension_semantics<parallel>], iteration_bounds = array<i64: 2>, scalar_prefetch = 0 : i64, scratch_operands = 0 : i64, tpu.core_type = #tpu.core_type<tc>, window_params = [{transform_indices = @transform_0, window_bounds = array<i64: 1, 512, 36>}, {pipeline_mode = #tpu.pipeline_mode<synchronous>, transform_indices = @transform_1, window_bounds = array<i64: 36, 128>}, {pipeline_mode = #tpu.pipeline_mode<synchronous>, transform_indices = @transform_2, window_bounds = array<i64: 1, 128>}, {pipeline_mode = #tpu.pipeline_mode<synchronous>, transform_indices = @transform_3, window_bounds = array<i64: 1, 128>}, {transform_indices = @transform_4, window_bounds = array<i64: 1, 1>}, {transform_indices = @transform_5, window_bounds = array<i64: 1, 2, 1>}]} {
    %c0 = arith.constant 0 : index
    %c0_0 = arith.constant 0 : index
    %c0_1 = arith.constant 0 : index
    %0 = vector.load %arg1[%c0, %c0_0, %c0_1] : memref<1x512x36xbf16, #tpu.memory_space<vmem>>, vector<1x512x36xbf16>
    %1 = vector.shape_cast %0 : vector<1x512x36xbf16> to vector<512x36xbf16>
    %c0_2 = arith.constant 0 : index
    %c0_3 = arith.constant 0 : index
    %2 = vector.load %arg2[%c0_2, %c0_3] : memref<36x128xbf16, #tpu.memory_space<vmem>>, vector<36x128xbf16>
    %cst = arith.constant dense<0.000000e+00> : vector<512x128xf32>
    %3 = tpu.matmul %1, %2, %cst {dimension_numbers = #tpu.dot_dimension_numbers<[1], [0], [0], [1], [0, 0, 1, 1], [], []>} : vector<512x36xbf16>, vector<36x128xbf16>, vector<512x128xf32> -> vector<512x128xf32>
    %c0_4 = arith.constant 0 : index
    %c0_5 = arith.constant 0 : index
    %4 = vector.load %arg3[%c0_4, %c0_5] : memref<1x128xf32, #tpu.memory_space<vmem>>, vector<1x128xf32>
    %5 = vector.broadcast %4 : vector<1x128xf32> to vector<512x128xf32>
    %6 = arith.addf %3, %5 : vector<512x128xf32>
    %7 = arith.negf %6 : vector<512x128xf32>
    %8 = math.exp %7 : vector<512x128xf32>
    %cst_6 = arith.constant 1.000000e+00 : f32
    %9 = vector.broadcast %cst_6 : f32 to vector<512x128xf32>
    %10 = arith.addf %9, %8 : vector<512x128xf32>
    %11 = arith.divf %9, %10 : vector<512x128xf32>
    %12 = arith.mulf %6, %11 : vector<512x128xf32>
    %13 = vector.shape_cast %12 : vector<512x128xf32> to vector<2x256x128xf32>
    %cst_7 = arith.constant dense<0.000000e+00> : vector<2x128xf32>
    %14 = vector.multi_reduction <add>, %13, %cst_7 [1] : vector<2x256x128xf32> to vector<2x128xf32>
    %cst_8 = arith.constant 3.906250e-03 : f32
    %15 = vector.broadcast %cst_8 : f32 to vector<2x128xf32>
    %16 = arith.mulf %14, %15 : vector<2x128xf32>
    %c0_9 = arith.constant 0 : index
    %c0_10 = arith.constant 0 : index
    %17 = vector.load %arg4[%c0_9, %c0_10] : memref<1x128xf32, #tpu.memory_space<vmem>>, vector<1x128xf32>
    %18 = vector.broadcast %17 : vector<1x128xf32> to vector<2x128xf32>
    %19 = arith.mulf %16, %18 : vector<2x128xf32>
    %cst_11 = arith.constant dense<0.000000e+00> : vector<2xf32>
    %20 = vector.multi_reduction <add>, %19, %cst_11 [1] : vector<2x128xf32> to vector<2xf32>
    %21 = vector.shape_cast %20 : vector<2xf32> to vector<2x1xf32>
    %c0_12 = arith.constant 0 : index
    %c0_13 = arith.constant 0 : index
    %22 = memref.load %arg5[%c0_12, %c0_13] : memref<1x1xf32, #tpu.memory_space<smem>>
    %23 = vector.broadcast %22 : f32 to vector<2x1xf32>
    %24 = arith.addf %21, %23 : vector<2x1xf32>
    %c0_14 = arith.constant 0 : index
    %c0_15 = arith.constant 0 : index
    %c0_16 = arith.constant 0 : index
    %25 = vector.load %arg6[%c0_14, %c0_15, %c0_16] : memref<1x2x1xf32, #tpu.memory_space<vmem>>, vector<1x2x1xf32>
    %26 = vector.shape_cast %25 : vector<1x2x1xf32> to vector<2x1xf32>
    %27 = vector.shape_cast %24 : vector<2x1xf32> to vector<1x2x1xf32>
    tpu.vector_store %arg6[%c0_14, %c0_15, %c0_16], %27 {strides = array<i32>} : memref<1x2x1xf32, #tpu.memory_space<vmem>>, vector<1x2x1xf32>,
    return
  }
  func.func @transform_0(%arg0: i32) -> (i32, i32, i32) {
    %c0_i32 = arith.constant 0 : i32
    %c0_i32_0 = arith.constant 0 : i32
    %c0_i32_1 = arith.constant 0 : i32
    return %arg0, %c0_i32, %c0_i32_0 : i32, i32, i32
  }
  func.func @transform_1(%arg0: i32) -> (i32, i32) {
    %c0_i32 = arith.constant 0 : i32
    %c0_i32_0 = arith.constant 0 : i32
    %c0_i32_1 = arith.constant 0 : i32
    return %c0_i32, %c0_i32_0 : i32, i32
  }
  func.func @transform_2(%arg0: i32) -> (i32, i32) {
    %c0_i32 = arith.constant 0 : i32
    %c0_i32_0 = arith.constant 0 : i32
    %c0_i32_1 = arith.constant 0 : i32
    return %c0_i32, %c0_i32_0 : i32, i32
  }
  func.func @transform_3(%arg0: i32) -> (i32, i32) {
    %c0_i32 = arith.constant 0 : i32
    %c0_i32_0 = arith.constant 0 : i32
    %c0_i32_1 = arith.constant 0 : i32
    return %c0_i32, %c0_i32_0 : i32, i32
  }
  func.func @transform_4(%arg0: i32) -> (i32, i32) {
    %c0_i32 = arith.constant 0 : i32
    %c0_i32_0 = arith.constant 0 : i32
    %c0_i32_1 = arith.constant 0 : i32
    return %c0_i32, %c0_i32_0 : i32, i32
  }
  func.func @transform_5(%arg0: i32) -> (i32, i32, i32) {
    %c0_i32 = arith.constant 0 : i32
    %c0_i32_0 = arith.constant 0 : i32
    %c0_i32_1 = arith.constant 0 : i32
    return %arg0, %c0_i32, %c0_i32_0 : i32, i32, i32
  }
}

</mosaic_0001>

<bundles_post_ra>
// kernel: discriminator_forward.1
= control target key start
LH: loop header
LB: loop body
LE: loop exit
PB: predicated region body
PF: predicated region fallthrough
CT: control target
= control target key end

     0   :  { %s2063_s20 = smov 0   ;;  %s2620_s0 = inlined_call_operand.vmem [shape: bf16[2,512,36], index: 0, kind: input, shape index: {}]   ;;  %s2621_s1 = inlined_call_operand.vmem [shape: bf16[36,128], index: 1, kind: input, shape index: {}]   ;;  %s2622_s2 = inlined_call_operand.vmem [shape: f32[1,128], index: 2, kind: input, shape index: {}]   ;;  %s2623_s3 = inlined_call_operand.vmem [shape: f32[1,128], index: 3, kind: input, shape index: {}]   ;;  %s2624_s4 = inlined_call_operand.<no memory space> [shape: f32[1,1], index: 4, kind: input, shape index: {}]   ;;  %s2625_s5 = inlined_call_operand.vmem [shape: f32[2,2,1], index: 5, kind: output, shape index: {}]  }
   0x1   :  { %10 = sst [smem:[#allocation2]] %s2624_s4 }
   0x2 LB: > { %s1466_s21 = sadd.s32 4294967295, %s2028_s20   ;;  %p1470_p0 = scmp.ge.s32.totalorder %s2028_s20, 1  ;;  %s2028_s20 = sphi %s2063_s20, %s16_s20  }
   0x3   : > { %p188_p1 = scmp.lt.s32.totalorder %s2028_s20, 3 }
   0x5   : > { %p189_p2 = pnand %p1470_p0, %p188_p1 }
   0x7   : > { %192 = sbr.rel (%p189_p2) target bundleno = 559 (0x22f), region = 40 }
   0xe   : > { %v1731_v0 = vld [vmem:[%s2621_s1] sm:$0xff]   ;;  %v1732_v1 = vld [vmem:[%s2621_s1 + $0x8] sm:$0xff]   ;;  %p215_p3 = scmp.lt.s32.totalorder %s1466_s21, 1  ;;  %v1733_v2 = vld [vmem:[%s2621_s1 + $0x10] ss:$0 sps:$4 sm:$0x33]  }
   0xf   : > { %1645 = vmatprep.subr.bf16.mxu0 %v1731_v0  ;;  %1715 = vmatprep.subr.bf16.mxu1 %v1731_v0  ;;  %vm573_vm0 = vcmask 1041408   ;;  %vm476_vm1 = vcmask 293888   ;;  %v2158_v36 = vld [vmem:[%s2622_s2] ss:$0 sm:$0xff]  ;;  %vm1402_vm2 = vcmask 1041409   ;;  %s1408_s10 = sld [smem:[#allocation2]] }
  0x10   : > { %1646 = vmatpush3.bf16.msra.mxu0 %v1731_v0  ;;  %1718 = vmatpush3.bf16.msra.mxu1 %v1731_v0  ;;  %s2651_s21 = smov (!%p215_p3, %s1466_s21), 1  ;;  %v575_v4 = vsel %vm573_vm0, %v1733_v2, 0  ;;  %vm1411_vm3 = vcmask 1024  }
  0x11   : > { %1647 = vmatprep.subr.bf16.mxu0 %v1732_v1  ;;  %1716 = vmatprep.subr.bf16.mxu1 %v1732_v1  ;;  %s1609_s27 = sshll.u32 %s2651_s21, 8  ;;  %s1473_s11 = sshll.u32 %s2651_s21, 1 }
  0x12   : > { %s2086_s30 = scalar_lea.vmem %s2620_s0, %s1609_s27  ;;  %s223_s14 = scalar_lea.vmem %s2625_s5, %s1473_s11 }
  0x13   : > { %v1734_v3 = vld [vmem:[%s2086_s30] sm:$0xff]   ;;  %v1736_v6 = vld [vmem:[%s2086_s30 + $0x8] sm:$0xff]   ;;  %v1738_v8 = vld [vmem:[%s2086_s30 + $0x10] sm:$0xff]  }
  0x14   : > { %1648 = vmatpush3.bf16.msra.mxu0 %v1732_v1  ;;  %1719 = vmatpush3.bf16.msra.mxu1 %v1732_v1  ;;  %v1735_v5 = vld [vmem:[%s2086_s30 + $0x80] sm:$0xff]   ;;  %v1737_v7 = vld [vmem:[%s2086_s30 + $0x88] sm:$0xff]   ;;  %v1739_v9 = vld [vmem:[%s2086_s30 + $0x90] sm:$0xff]  }
  0x15   : > { %1721 = vmatprep.subr.msk.bf16.mxu0 %vm573_vm0, %v1733_v2  ;;  %1722 = vmatprep.subr.msk.bf16.mxu1 %vm573_vm0, %v1733_v2  ;;  %v1740_v10 = vld [vmem:[%s2086_s30 + $0x18] sm:$0xff]   ;;  %v1742_v12 = vld [vmem:[%s2086_s30 + $0x20] sm:$0xff]   ;;  %v1744_v14 = vld [vmem:[%s2086_s30 + $0x28] sm:$0xff]  }
  0x16   : > { %1651 = vmatprep.mubr.msk.bf16.mxu0 %vm476_vm1, %v1734_v3  ;;  %1683 = vmatprep.mubr.msk.bf16.mxu1 %vm476_vm1, %v1735_v5  ;;  %v1741_v11 = vld [vmem:[%s2086_s30 + $0x98] sm:$0xff]   ;;  %v1743_v13 = vld [vmem:[%s2086_s30 + $0xa0] sm:$0xff]   ;;  %v1745_v15 = vld [vmem:[%s2086_s30 + $0xa8] sm:$0xff]  }
  0x17   : > { %v1746_v16 = vld [vmem:[%s2086_s30 + $0x30] sm:$0xff]   ;;  %v1748_v18 = vld [vmem:[%s2086_s30 + $0x38] sm:$0xff]   ;;  %v1750_v20 = vld [vmem:[%s2086_s30 + $0x40] sm:$0xff]  }
  0x18   : > { %1650 = vmatpush3.bf16.msra.mxu0 %v575_v4  ;;  %1720 = vmatpush3.bf16.msra.mxu1 %v575_v4  ;;  %v1747_v17 = vld [vmem:[%s2086_s30 + $0xb0] sm:$0xff]   ;;  %v1749_v19 = vld [vmem:[%s2086_s30 + $0xb8] sm:$0xff]   ;;  %v1751_v21 = vld [vmem:[%s2086_s30 + $0xc0] sm:$0xff]  }
  0x19   : > { %v1752_v22 = vld [vmem:[%s2086_s30 + $0x48] sm:$0xff]   ;;  %v1754_v24 = vld [vmem:[%s2086_s30 + $0x50] sm:$0xff]   ;;  %v1756_v26 = vld [vmem:[%s2086_s30 + $0x58] sm:$0xff]  }
  0x1a   : > { %v1753_v23 = vld [vmem:[%s2086_s30 + $0xc8] sm:$0xff]   ;;  %v1755_v25 = vld [vmem:[%s2086_s30 + $0xd0] sm:$0xff]   ;;  %v1757_v27 = vld [vmem:[%s2086_s30 + $0xd8] sm:$0xff]  }
  0x1b   : > { %1652 = vmatmul.mubr.msk.bf16.vlgmr.msra.gmra.mrb[0].mxu0 %vm476_vm1, %v1736_v6  ;;  %1684 = vmatmul.mubr.msk.bf16.vlgmr.msra.gmra.mrb[0].mxu1 %vm476_vm1, %v1737_v7  ;;  %v1758_v28 = vld [vmem:[%s2086_s30 + $0x60] sm:$0xff]   ;;  %v1760_v30 = vld [vmem:[%s2086_s30 + $0x68] sm:$0xff]   ;;  %v1762_v32 = vld [vmem:[%s2086_s30 + $0x70] sm:$0xff]  }
  0x1c   : > { %1655 = vmatprep.mubr.msk.bf16.mxu0 %vm476_vm1, %v1738_v8  ;;  %1687 = vmatprep.mubr.msk.bf16.mxu1 %vm476_vm1, %v1739_v9  ;;  %v1759_v29 = vld [vmem:[%s2086_s30 + $0xe0] sm:$0xff]   ;;  %v1761_v31 = vld [vmem:[%s2086_s30 + $0xe8] sm:$0xff]   ;;  %v1763_v33 = vld [vmem:[%s2086_s30 + $0xf0] sm:$0xff]  }
  0x1d   : > { %v1764_v34 = vld [vmem:[%s2086_s30 + $0x78] sm:$0xff]  }
  0x1e   : > { %v1765_v35 = vld [vmem:[%s2086_s30 + $0xf8] sm:$0xff]  }
  0x23   : > { %1656 = vmatmul.mubr.msk.bf16.gmra.mrb[4].mxu0 %vm476_vm1, %v1740_v10  ;;  %1688 = vmatmul.mubr.msk.bf16.gmra.mrb[4].mxu1 %vm476_vm1, %v1741_v11 }
  0x24   : > { %1659 = vmatprep.mubr.msk.bf16.mxu0 %vm476_vm1, %v1742_v12  ;;  %1691 = vmatprep.mubr.msk.bf16.mxu1 %vm476_vm1, %v1743_v13 }
  0x2b   : > { %1660 = vmatmul.mubr.msk.bf16.gmra.mrb[8].mxu0 %vm476_vm1, %v1744_v14  ;;  %1692 = vmatmul.mubr.msk.bf16.gmra.mrb[8].mxu1 %vm476_vm1, %v1745_v15 }
  0x2c   : > { %1663 = vmatprep.mubr.msk.bf16.mxu0 %vm476_vm1, %v1746_v16  ;;  %1695 = vmatprep.mubr.msk.bf16.mxu1 %vm476_vm1, %v1747_v17 }
  0x33   : > { %1664 = vmatmul.mubr.msk.bf16.gmra.mrb[12].mxu0 %vm476_vm1, %v1748_v18  ;;  %1696 = vmatmul.mubr.msk.bf16.gmra.mrb[12].mxu1 %vm476_vm1, %v1749_v19 }
  0x34   : > { %1667 = vmatprep.mubr.msk.bf16.mxu0 %vm476_vm1, %v1750_v20  ;;  %1699 = vmatprep.mubr.msk.bf16.mxu1 %vm476_vm1, %v1751_v21 }
  0x3b   : > { %1668 = vmatmul.mubr.msk.bf16.gmra.mrb[16].mxu0 %vm476_vm1, %v1752_v22  ;;  %1700 = vmatmul.mubr.msk.bf16.gmra.mrb[16].mxu1 %vm476_vm1, %v1753_v23 }
  0x3c   : > { %1671 = vmatprep.mubr.msk.bf16.mxu0 %vm476_vm1, %v1754_v24  ;;  %1703 = vmatprep.mubr.msk.bf16.mxu1 %vm476_vm1, %v1755_v25 }
  0x43   : > { %1672 = vmatmul.mubr.msk.bf16.gmra.mrb[20].mxu0 %vm476_vm1, %v1756_v26  ;;  %1704 = vmatmul.mubr.msk.bf16.gmra.mrb[20].mxu1 %vm476_vm1, %v1757_v27 }
  0x44   : > { %1675 = vmatprep.mubr.msk.bf16.mxu0 %vm476_vm1, %v1758_v28  ;;  %1707 = vmatprep.mubr.msk.bf16.mxu1 %vm476_vm1, %v1759_v29 }
  0x4b   : > { %1676 = vmatmul.mubr.msk.bf16.gmra.mrb[24].mxu0 %vm476_vm1, %v1760_v30  ;;  %1708 = vmatmul.mubr.msk.bf16.gmra.mrb[24].mxu1 %vm476_vm1, %v1761_v31 }
  0x4c   : > { %1679 = vmatprep.mubr.msk.bf16.mxu0 %vm476_vm1, %v1762_v32  ;;  %1711 = vmatprep.mubr.msk.bf16.mxu1 %vm476_vm1, %v1763_v33 }
  0x53   : > { %1680 = vmatmul.mubr.msk.bf16.gmra.mrb[28].mxu0 %vm476_vm1, %v1764_v34  ;;  %1712 = vmatmul.mubr.msk.bf16.gmra.mrb[28].mxu1 %vm476_vm1, %v1765_v35 }
  0xee   : > { %v1653_v37 = vpop.f32.mrb[0].mxu0  ;;  %v1685_v38 = vpop.f32.mrb[0].mxu1 }
  0xef   : > { %v2161_v39 = vadd.f32 %v1653_v37, %v2158_v36  ;;  %v2164_v40 = vadd.f32 %v1685_v38, %v2158_v36  ;;  %v611_v41 = vpop.f32.mrb[1].mxu0  ;;  %v739_v42 = vpop.f32.mrb[1].mxu1 }
  0xf0   : > { %v2167_v43 = vadd.f32 %v2158_v36, %v611_v41  ;;  %v2170_v44 = vadd.f32 %v2158_v36, %v739_v42  ;;  %v1654_v45 = vpop.f32.mrb[2].mxu0  ;;  %v1686_v46 = vpop.f32.mrb[2].mxu1 }
  0xf1   : > { %v1544_v47 = vmul.f32 -1.442695, %v2161_v39  ;;  %v1576_v48 = vmul.f32 -1.442695, %v2164_v40  ;;  %v2175_v49 = vadd.f32 %v1654_v45, %v2158_v36  ;;  %v2178_v50 = vadd.f32 %v1686_v46, %v2158_v36  ;;  %v614_v51 = vpop.f32.mrb[3].mxu0  ;;  %v742_v52 = vpop.f32.mrb[3].mxu1 }
  0xf2   : > { %v1542_v53 = vmul.f32 -1.442695, %v2167_v43  ;;  %v1574_v54 = vmul.f32 -1.442695, %v2170_v44  ;;  %v2183_v55 = vadd.f32 %v2158_v36, %v614_v51  ;;  %v2186_v56 = vadd.f32 %v2158_v36, %v742_v52 }
  0xf3   : > { %1766 = vpow2.f32 %v1544_v47  ;;  %v1545_v57 = vmul.f32 -1.442695, %v2175_v49  ;;  %v1577_v58 = vmul.f32 -1.442695, %v2178_v50 }
  0xf4   : > { %1768 = vpow2.f32 %v1576_v48  ;;  %v1543_v59 = vmul.f32 -1.442695, %v2183_v55  ;;  %v1575_v60 = vmul.f32 -1.442695, %v2186_v56 }
  0xf5   : > { %1770 = vpow2.f32 %v1542_v53 }
  0xf6   : > { %1772 = vpow2.f32 %v1574_v54  ;;  %v1657_v61 = vpop.f32.mrb[4].mxu0  ;;  %v1689_v62 = vpop.f32.mrb[4].mxu1 }
  0xf7   : > { %1774 = vpow2.f32 %v1545_v57  ;;  %v2193_v63 = vadd.f32 %v1657_v61, %v2158_v36  ;;  %v627_v0 = vpop.f32.mrb[5].mxu0  ;;  %v755_v1 = vpop.f32.mrb[5].mxu1  ;;  %v2196_v2 = vadd.f32 %v1689_v62, %v2158_v36 }
  0xf8   : > { %1776 = vpow2.f32 %v1577_v58  ;;  %v2199_v3 = vadd.f32 %v2158_v36, %v627_v0  ;;  %v2202_v4 = vadd.f32 %v2158_v36, %v755_v1  ;;  %v1658_v5 = vpop.f32.mrb[6].mxu0  ;;  %v1690_v6 = vpop.f32.mrb[6].mxu1 }
  0xf9   : > { %1778 = vpow2.f32 %v1543_v59  ;;  %v1548_v7 = vmul.f32 -1.442695, %v2193_v63  ;;  %v2206_v8 = vadd.f32 %v1658_v5, %v2158_v36  ;;  %v630_v9 = vpop.f32.mrb[7].mxu0  ;;  %v758_v10 = vpop.f32.mrb[7].mxu1  ;;  %v1580_v13 = vmul.f32 -1.442695, %v2196_v2 }
  0xfa   : > { %1780 = vpow2.f32 %v1575_v60  ;;  %v1546_v11 = vmul.f32 -1.442695, %v2199_v3  ;;  %v1578_v12 = vmul.f32 -1.442695, %v2202_v4  ;;  %v2213_v45 = vadd.f32 %v1690_v6, %v2158_v36 }
  0xfb   : > { %1782 = vpow2.f32 %v1548_v7  ;;  %v1549_v15 = vmul.f32 -1.442695, %v2206_v8  ;;  %v2216_v46 = vadd.f32 %v2158_v36, %v630_v9  ;;  %v2219_v51 = vadd.f32 %v2158_v36, %v758_v10 }
  0xfc   : > { %1784 = vpow2.f32 %v1546_v11  ;;  %v1581_v0 = vmul.f32 -1.442695, %v2213_v45 }
  0xfd   : > { %v1767_v14 = vpop.eup %1766  ;;  %1786 = vpow2.f32 %v1578_v12  ;;  %v1547_v9 = vmul.f32 -1.442695, %v2216_v46 }
  0xfe   : > { %v1769_v16 = vpop.eup %1768  ;;  %v1060_v17 = vadd.f32 1.0, %v1767_v14  ;;  %v1661_v18 = vpop.f32.mrb[8].mxu0  ;;  %1788 = vpow2.f32 %v1580_v13  ;;  %v1579_v14 = vmul.f32 -1.442695, %v2219_v51 }
  0xff   : > { %v1693_v19 = vpop.f32.mrb[8].mxu1  ;;  %v1771_v20 = vpop.eup %1770  ;;  %v1092_v21 = vadd.f32 1.0, %v1769_v16  ;;  %1790 = vpow2.f32 %v1549_v15  ;;  %v2226_v59 = vadd.f32 %v1661_v18, %v2158_v36 }
 0x100   : > { %v643_v22 = vpop.f32.mrb[9].mxu0  ;;  %v771_v23 = vpop.f32.mrb[9].mxu1  ;;  %v1058_v25 = vadd.f32 1.0, %v1771_v20  ;;  %1792 = vrcp.f32 %v1060_v17  ;;  %v2234_v1 = vadd.f32 %v1693_v19, %v2158_v36 }
 0x101   : > { %v1773_v24 = vpop.eup %1772  ;;  %v1662_v26 = vpop.f32.mrb[10].mxu0  ;;  %1794 = vrcp.f32 %v1092_v21  ;;  %v2242_v10 = vadd.f32 %v2158_v36, %v643_v22  ;;  %v2245_v11 = vadd.f32 %v2158_v36, %v771_v23  ;;  %v1552_v18 = vmul.f32 -1.442695, %v2226_v59 }
 0x102   : > { %v1694_v27 = vpop.f32.mrb[10].mxu1  ;;  %v1775_v28 = vpop.eup %1774  ;;  %v1090_v29 = vadd.f32 1.0, %v1773_v24  ;;  %1796 = vrcp.f32 %v1058_v25  ;;  %v2251_v15 = vadd.f32 %v1662_v26, %v2158_v36  ;;  %v1584_v22 = vmul.f32 -1.442695, %v2234_v1 }
 0x103   : > { %v646_v30 = vpop.f32.mrb[11].mxu0  ;;  %v1777_v31 = vpop.eup %1776  ;;  %v1061_v35 = vadd.f32 1.0, %v1775_v28  ;;  %v2254_v16 = vadd.f32 %v1694_v27, %v2158_v36  ;;  %v1550_v24 = vmul.f32 -1.442695, %v2242_v10  ;;  %v1582_v25 = vmul.f32 -1.442695, %v2245_v11 }
 0x104   : > { %v774_v32 = vpop.f32.mrb[11].mxu1  ;;  %v1779_v33 = vpop.eup %1778  ;;  %1798 = vrcp.f32 %v1090_v29  ;;  %v1093_v41 = vadd.f32 1.0, %v1777_v31  ;;  %v2258_v19 = vadd.f32 %v2158_v36, %v646_v30  ;;  %v1553_v29 = vmul.f32 -1.442695, %v2251_v15 }
 0x105   : > { %v1781_v34 = vpop.eup %1780  ;;  %v1059_v37 = vadd.f32 1.0, %v1779_v33  ;;  %v2261_v20 = vadd.f32 %v2158_v36, %v774_v32  ;;  %v1585_v30 = vmul.f32 -1.442695, %v2254_v16 }
 0x106   : > { %v1783_v38 = vpop.eup %1782  ;;  %v1091_v42 = vadd.f32 1.0, %v1781_v34  ;;  %v1665_v47 = vpop.f32.mrb[12].mxu0 }
 0x107   : > { %1800 = vrcp.f32 %v1059_v37  ;;  %v1785_v48 = vpop.eup %1784  ;;  %v2221_v52 = vpop.f32.mrb[12].mxu1  ;;  %v1064_v57 = vadd.f32 1.0, %v1783_v38  ;;  %v2273_v31 = vadd.f32 %v1665_v47, %v2158_v36  ;;  %v1583_v37 = vmul.f32 -1.442695, %v2261_v20 }
 0x108   : > { %1802 = vrcp.f32 %v1091_v42  ;;  %v2223_v53 = vpop.f32.mrb[13].mxu0  ;;  %v1787_v54 = vpop.eup %1786  ;;  %v1062_v58 = vadd.f32 1.0, %v1785_v48 }
 0x109   : > { %1804 = vrcp.f32 %v1061_v35  ;;  %v2228_v60 = vpop.f32.mrb[13].mxu1  ;;  %v2230_v61 = vpop.f32.mrb[14].mxu0  ;;  %v1094_v62 = vadd.f32 1.0, %v1787_v54  ;;  %v1551_v35 = vmul.f32 -1.442695, %v2258_v19 }
 0x10a   : > { %1806 = vrcp.f32 %v1093_v41  ;;  %v2236_v5 = vpop.f32.mrb[14].mxu1  ;;  %v2238_v6 = vpop.f32.mrb[15].mxu0 }
 0x10b   : > { %v1789_v7 = vpop.eup %1788  ;;  %1808 = vrcp.f32 %v1062_v58  ;;  %v2247_v12 = vpop.f32.mrb[15].mxu1 }
 0x10c   : > { %v1791_v13 = vpop.eup %1790  ;;  %1810 = vrcp.f32 %v1094_v62  ;;  %v1096_v54 = vadd.f32 1.0, %v1789_v7  ;;  %v1556_v7 = vmul.f32 -1.442695, %v2273_v31 }
 0x10d   : > { %v1793_v17 = vpop.eup %1792  ;;  %1812 = vrcp.f32 %v1064_v57 }
 0x10e   : > { %v1795_v21 = vpop.eup %1794  ;;  %1814 = vpow2.f32 %v1581_v0  ;;  %v2266_v26 = vpop.f32.mrb[16].mxu0 }
 0x10f   : > { %v1797_v23 = vpop.eup %1796  ;;  %1816 = vpow2.f32 %v1547_v9  ;;  %v2268_v27 = vpop.f32.mrb[16].mxu1 }
 0x110   : > { %v1799_v28 = vpop.eup %1798  ;;  %1818 = vpow2.f32 %v1579_v14  ;;  %v2275_v32 = vpop.f32.mrb[17].mxu0  ;;  %v1250_v48 = vmul.f32 %v1797_v23, %v2167_v43  ;;  %v2295_v14 = vadd.f32 %v2221_v52, %v2158_v36  ;;  %v1252_v43 = vmul.f32 %v1793_v17, %v2161_v39 }
 0x111   : > { %v2277_v33 = vpop.f32.mrb[17].mxu1  ;;  %v1801_v34 = vpop.eup %1800  ;;  %1820 = vpow2.f32 %v1552_v18  ;;  %v1282_v0 = vmul.f32 %v1799_v28, %v2170_v44  ;;  %v1284_v23 = vmul.f32 %v1795_v21, %v2164_v40 }
 0x112   : > { %v2281_v38 = vpop.f32.mrb[18].mxu0  ;;  %v2283_v41 = vpop.f32.mrb[18].mxu1  ;;  %v1251_v47 = vmul.f32 %v1801_v34, %v2183_v55  ;;  %1822 = vpow2.f32 %v1584_v22 }
 0x113   : > { %v1803_v42 = vpop.eup %1802  ;;  %v2287_v57 = vpop.f32.mrb[19].mxu0  ;;  %1824 = vpow2.f32 %v1550_v24 }
 0x114   : > { %v2289_v58 = vpop.f32.mrb[19].mxu1  ;;  %v1805_v62 = vpop.eup %1804  ;;  %v1283_v9 = vmul.f32 %v1803_v42, %v2186_v56  ;;  %v1314_v55 = vadd.f32 %v1251_v47, %v1250_v48  ;;  %1826 = vpow2.f32 %v1582_v25 }
 0x115   : > { %2628 = vst [vmem:[#allocation3_spill] sm:$0xff] %v2289_v58  ;;  %v1807_v18 = vpop.eup %1806  ;;  %v1065_v58 = vadd.f32 1.0, %v1791_v13  ;;  %1828 = vpow2.f32 %v1553_v29  ;;  %v1253_v56 = vmul.f32 %v1805_v62, %v2175_v49  ;;  %v1588_v62 = vmul.f32 -1.442695, %v2295_v14 }
 0x116   : > { %v1809_v22 = vpop.eup %1808  ;;  %v1351_v34 = vadd.f32 %v1283_v9, %v1282_v0  ;;  %v1315_v24 = vadd.f32 %v1314_v55, %v1252_v43  ;;  %1830 = vpow2.f32 %v1585_v30  ;;  %v1285_v39 = vmul.f32 %v1807_v18, %v2178_v50  ;;  %v2306_v42 = vpop.f32.mrb[20].mxu0 }
 0x117   : > { %v1811_v44 = vpop.eup %1810  ;;  %v1254_v52 = vmul.f32 %v1809_v22, %v2199_v3  ;;  %1832 = vpow2.f32 %v1551_v35  ;;  %v2308_v40 = vpop.f32.mrb[20].mxu1 }
 0x118   : > { %v2302_v28 = vpop.eup %1812  ;;  %v1352_v17 = vadd.f32 %v1351_v34, %v1284_v23  ;;  %v1286_v25 = vmul.f32 %v1811_v44, %v2202_v4  ;;  %v1316_v21 = vadd.f32 %v1315_v24, %v1253_v56  ;;  %1834 = vpow2.f32 %v1583_v37  ;;  %v2310_v49 = vpop.f32.mrb[21].mxu0 }
 0x119   : > { %v1815_v13 = vpop.eup %1814  ;;  %v2312_v29 = vpop.f32.mrb[21].mxu1  ;;  %1836 = vrcp.f32 %v1096_v54 }
 0x11a   : > { %v1817_v3 = vpop.eup %1816  ;;  %v1353_v30 = vadd.f32 %v1352_v17, %v1285_v39  ;;  %v2314_v48 = vpop.f32.mrb[22].mxu0  ;;  %v2318_v35 = vadd.f32 %v1316_v21, %v1254_v52  ;;  %1838 = vrcp.f32 %v1065_v58  ;;  %v1097_v54 = vadd.f32 1.0, %v1815_v13 }
 0x11b   : > { %v2316_v50 = vpop.f32.mrb[22].mxu1  ;;  %v1819_v4 = vpop.eup %1818  ;;  %v1063_v47 = vadd.f32 1.0, %v1817_v3  ;;  %1840 = vpow2.f32 %v1556_v7  ;;  %v2331_v17 = vadd.f32 %v2158_v36, %v2223_v53  ;;  %v2335_v7 = vadd.f32 %v2158_v36, %v2228_v60 }
 0x11c   : > { %v2321_v0 = vpop.f32.mrb[23].mxu0  ;;  %v2323_v37 = vpop.f32.mrb[23].mxu1  ;;  %v2325_v18 = vadd.f32 %v1353_v30, %v1286_v25  ;;  %v1095_v43 = vadd.f32 1.0, %v1819_v4  ;;  %v2343_v3 = vadd.f32 %v2230_v61, %v2158_v36  ;;  %v2347_v30 = vadd.f32 %v2236_v5, %v2158_v36 }
 0x11d   : > { %v1821_v9 = vpop.eup %1820  ;;  %1842 = vrcp.f32 %v1063_v47  ;;  %v2351_v53 = vadd.f32 %v2158_v36, %v2238_v6  ;;  %v2359_v61 = vadd.f32 %v2158_v36, %v2247_v12  ;;  %v2374_v12 = vadd.f32 %v2158_v36, %v2275_v32 }
 0x11e   : > { %v1823_v55 = vpop.eup %1822  ;;  %1844 = vrcp.f32 %v1095_v43  ;;  %v1068_v34 = vadd.f32 1.0, %v1821_v9  ;;  %v2327_v52 = vpop.f32.mrb[24].mxu0  ;;  %2629 = vst [vmem:[#allocation4_spill] sm:$0xff] %v2347_v30 }
 0x11f   : > { %v1825_v22 = vpop.eup %1824  ;;  %1846 = vpow2.f32 %v1588_v62  ;;  %v1100_v56 = vadd.f32 1.0, %v1823_v55  ;;  %v2337_v25 = vpop.f32.mrb[24].mxu1 }
 0x120   : > { %v1827_v23 = vpop.eup %1826  ;;  %v1066_v58 = vadd.f32 1.0, %v1825_v22  ;;  %1848 = vrcp.f32 %v1097_v54  ;;  %v2339_v13 = vpop.f32.mrb[25].mxu0  ;;  %v2367_v22 = vadd.f32 %v2266_v26, %v2158_v36  ;;  %v1589_v26 = vmul.f32 -1.442695, %v2347_v30 }
 0x121   : > { %v1829_v44 = vpop.eup %1828  ;;  %v1098_v24 = vadd.f32 1.0, %v1827_v23  ;;  %v2353_v60 = vpop.f32.mrb[25].mxu1 }
 0x122   : > { %v1831_v39 = vpop.eup %1830  ;;  %1850 = vrcp.f32 %v1066_v58  ;;  %v2355_v4 = vpop.f32.mrb[26].mxu0  ;;  %v1069_v62 = vadd.f32 1.0, %v1829_v44  ;;  %2633 = vst [vmem:[#allocation8_spill] sm:$0xff] %v2367_v22  ;;  %v1554_v58 = vmul.f32 -1.442695, %v2331_v17 }
 0x123   : > { %v1833_v21 = vpop.eup %1832  ;;  %1852 = vrcp.f32 %v1098_v24  ;;  %2630 = vst [vmem:[#allocation5_spill] sm:$0xff] %v2355_v4  ;;  %v2361_v54 = vpop.f32.mrb[26].mxu1  ;;  %v1101_v6 = vadd.f32 1.0, %v1831_v39  ;;  %v1557_v24 = vmul.f32 -1.442695, %v2343_v3  ;;  %v1256_v4 = vmul.f32 %v2302_v28, %v2193_v63 }
 0x124   : > { %v1835_v47 = vpop.eup %1834  ;;  %1854 = vrcp.f32 %v1068_v34  ;;  %v1067_v9 = vadd.f32 1.0, %v1833_v21  ;;  %2631 = vst [vmem:[#allocation6_spill] sm:$0xff] %v2361_v54  ;;  %v2363_v5 = vpop.f32.mrb[27].mxu0  ;;  %v1555_v21 = vmul.f32 -1.442695, %v2351_v53 }
 0x125   : > { %2632 = vst [vmem:[#allocation7_spill] sm:$0xff] %v2363_v5  ;;  %v1837_v43 = vpop.eup %1836  ;;  %1856 = vrcp.f32 %v1100_v56  ;;  %v1099_v55 = vadd.f32 1.0, %v1835_v47  ;;  %v2369_v23 = vpop.f32.mrb[27].mxu1  ;;  %v1586_v56 = vmul.f32 -1.442695, %v2335_v7 }
 0x126   : > { %2634 = vst [vmem:[#allocation9_spill] sm:$0xff] %v2369_v23  ;;  %v1839_v34 = vpop.eup %1838  ;;  %1858 = vrcp.f32 %v1067_v9  ;;  %v1587_v47 = vmul.f32 -1.442695, %v2359_v61  ;;  %v1560_v32 = vmul.f32 -1.442695, %v2367_v22  ;;  %v2387_v5 = vpop.f32.mrb[28].mxu0 }
 0x127   : > { %v1841_v44 = vpop.eup %1840  ;;  %1860 = vrcp.f32 %v1099_v55  ;;  %v2385_v55 = vadd.f32 %v2158_v36, %v2277_v33  ;;  %2635 = vst [vmem:[#allocation10_spill] sm:$0xff] %v2387_v5  ;;  %v2389_v54 = vpop.f32.mrb[28].mxu1  ;;  %v1288_v33 = vmul.f32 %v1837_v43, %v2196_v2  ;;  %v2413_v2 = vadd.f32 %v2158_v36, %v2287_v57 }
 0x128   : > { %v1843_v39 = vpop.eup %1842  ;;  %1862 = vrcp.f32 %v1069_v62  ;;  %2636 = vst [vmem:[#allocation11_spill] sm:$0xff] %v2389_v54  ;;  %v2403_v54 = vadd.f32 %v2281_v38, %v2158_v36 }
 0x129   : > { %v1845_v9 = vpop.eup %1844  ;;  %v1255_v23 = vmul.f32 %v1843_v39, %v2216_v46  ;;  %1864 = vrcp.f32 %v1101_v6  ;;  %v1558_v46 = vmul.f32 -1.442695, %v2374_v12  ;;  %v2395_v6 = vpop.f32.mrb[29].mxu0 }
 0x12a   : > { %v1847_v62 = vpop.eup %1846  ;;  %v1287_v30 = vmul.f32 %v1845_v9, %v2219_v51  ;;  %1866 = vpow2.f32 %v1554_v58  ;;  %v2397_v39 = vpop.f32.mrb[29].mxu1  ;;  %v1257_v58 = vmul.f32 %v1839_v34, %v2206_v8 }
 0x12b   : > { %v1849_v22 = vpop.eup %1848  ;;  %v1318_v5 = vadd.f32 %v2318_v35, %v1255_v23  ;;  %1868 = vpow2.f32 %v1586_v56  ;;  %v2405_v63 = vpop.f32.mrb[30].mxu0 }
 0x12c   : > { %2637 = vst [vmem:[#allocation12_spill] sm:$0xff] %v2405_v63  ;;  %v2407_v51 = vpop.f32.mrb[30].mxu1  ;;  %v1851_v28 = vpop.eup %1850  ;;  %v1355_v9 = vadd.f32 %v2325_v18, %v1287_v30  ;;  %1870 = vpow2.f32 %v1557_v24  ;;  %v1072_v63 = vadd.f32 1.0, %v1841_v44  ;;  %v1289_v8 = vmul.f32 %v1849_v22, %v2213_v45 }
 0x12d   : > { %2638 = vst [vmem:[#allocation13_spill] sm:$0xff] %v2407_v51  ;;  %v2415_v35 = vpop.f32.mrb[31].mxu0  ;;  %v2417_v43 = vpop.f32.mrb[31].mxu1  ;;  %v1319_v23 = vadd.f32 %v1318_v5, %v1256_v4  ;;  %v1258_v56 = vmul.f32 %v1851_v28, %v2242_v10  ;;  %1872 = vpow2.f32 %v1589_v26  ;;  %v2424_v24 = vadd.f32 %v2268_v27, %v2158_v36 }
 0x12e   : > { %v1853_v38 = vpop.eup %1852  ;;  %v1356_v34 = vadd.f32 %v1355_v9, %v1288_v33  ;;  %1874 = vpow2.f32 %v1555_v21  ;;  %v1590_v4 = vmul.f32 -1.442695, %v2385_v55  ;;  %v1561_v44 = vmul.f32 -1.442695, %v2403_v54 }
 0x12f   : > { %v1855_v51 = vpop.eup %1854  ;;  %v1290_v18 = vmul.f32 %v1853_v38, %v2245_v11  ;;  %v1320_v57 = vadd.f32 %v1319_v23, %v1257_v58  ;;  %1876 = vpow2.f32 %v1587_v47  ;;  %v2430_v45 = vadd.f32 %v2283_v41, %v2158_v36 }
 0x130   : > { %v1857_v30 = vpop.eup %1856  ;;  %v1357_v10 = vadd.f32 %v1356_v34, %v1289_v8  ;;  %1878 = vpow2.f32 %v1560_v32  ;;  %v1104_v21 = vadd.f32 1.0, %v1847_v62  ;;  %v1559_v28 = vmul.f32 -1.442695, %v2413_v2 }
 0x131   : > { %v1859_v5 = vpop.eup %1858  ;;  %v1321_v22 = vadd.f32 %v1320_v57, %v1258_v56  ;;  %1880 = vrcp.f32 %v1072_v63  ;;  %v1260_v58 = vmul.f32 %v1855_v51, %v2226_v59  ;;  %v1592_v41 = vmul.f32 -1.442695, %v2424_v24 }
 0x132   : > { %v1861_v11 = vpop.eup %1860  ;;  %v1259_v26 = vmul.f32 %v1859_v5, %v2258_v19  ;;  %v1358_v27 = vadd.f32 %v1357_v10, %v1290_v18  ;;  %1882 = vpow2.f32 %v1558_v46  ;;  %v1292_v23 = vmul.f32 %v1857_v30, %v2234_v1 }
 0x133   : > { %v1863_v47 = vpop.eup %1862  ;;  %v1291_v33 = vmul.f32 %v1861_v11, %v2261_v20  ;;  %1884 = vpow2.f32 %v1590_v4  ;;  %v1593_v62 = vmul.f32 -1.442695, %v2430_v45 }
 0x134   : > { %v1865_v32 = vpop.eup %1864  ;;  %v1322_v9 = vadd.f32 %v1321_v22, %v1259_v26  ;;  %1886 = vpow2.f32 %v1561_v44  ;;  %v1261_v20 = vmul.f32 %v1863_v47, %v2251_v15  ;;  %v2447_v47 = vadd.f32 %v2306_v42, %v2158_v36 }
 0x135   : > { %v1867_v38 = vpop.eup %1866  ;;  %v1359_v19 = vadd.f32 %v1358_v27, %v1291_v33  ;;  %1888 = vrcp.f32 %v1104_v21  ;;  %v1293_v59 = vmul.f32 %v1865_v32, %v2254_v16  ;;  %v2639_v16 = vld [vmem:[#allocation3_spill] sm:$0xff] }
 0x136   : > { %v1869_v63 = vpop.eup %1868  ;;  %v1323_v46 = vadd.f32 %v1322_v9, %v1260_v58  ;;  %v1070_v56 = vadd.f32 1.0, %v1867_v38  ;;  %1890 = vpow2.f32 %v1559_v28  ;;  %v2443_v26 = vadd.f32 %v2158_v36, %v2639_v16 }
 0x137   : > { %v1871_v8 = vpop.eup %1870  ;;  %v1360_v51 = vadd.f32 %v1359_v19, %v1292_v23  ;;  %v1102_v34 = vadd.f32 1.0, %v1869_v63  ;;  %v2451_v9 = vadd.f32 %v2308_v40, %v2158_v36  ;;  %v2460_v19 = vadd.f32 %v2158_v36, %v2312_v29 }
 0x138   : > { %v1873_v18 = vpop.eup %1872  ;;  %1892 = vrcp.f32 %v1070_v56  ;;  %v1324_v57 = vadd.f32 %v1323_v46, %v1261_v20  ;;  %v1073_v5 = vadd.f32 1.0, %v1871_v8  ;;  %v1591_v42 = vmul.f32 -1.442695, %v2443_v26 }
 0x139   : > { %v1875_v1 = vpop.eup %1874  ;;  %1894 = vrcp.f32 %v1102_v34  ;;  %v1361_v30 = vadd.f32 %v1360_v51, %v1293_v59  ;;  %v1105_v44 = vadd.f32 1.0, %v1873_v18  ;;  %v1564_v63 = vmul.f32 -1.442695, %v2447_v47 }
 0x13a   : > { %v1877_v4 = vpop.eup %1876  ;;  %v1071_v10 = vadd.f32 1.0, %v1875_v1  ;;  %1896 = vpow2.f32 %v1592_v41  ;;  %v2455_v41 = vadd.f32 %v2158_v36, %v2310_v49  ;;  %v2465_v40 = vadd.f32 %v2314_v48, %v2158_v36 }
 0x13b   : > { %v1879_v15 = vpop.eup %1878  ;;  %v1103_v11 = vadd.f32 1.0, %v1877_v4  ;;  %1898 = vpow2.f32 %v1593_v62  ;;  %v2469_v49 = vadd.f32 %v2316_v50, %v2158_v36  ;;  %v2473_v56 = vadd.f32 %v2158_v36, %v2321_v0 }
 0x13c   : > { %v1881_v22 = vpop.eup %1880  ;;  %1900 = vrcp.f32 %v1071_v10  ;;  %v1076_v33 = vadd.f32 1.0, %v1879_v15  ;;  %v2477_v29 = vadd.f32 %v2158_v36, %v2323_v37  ;;  %v1596_v48 = vmul.f32 -1.442695, %v2451_v9 }
 0x13d   : > { %v1883_v21 = vpop.eup %1882  ;;  %1902 = vrcp.f32 %v1103_v11  ;;  %v1562_v50 = vmul.f32 -1.442695, %v2455_v41  ;;  %v1594_v18 = vmul.f32 -1.442695, %v2460_v19  ;;  %v2486_v0 = vadd.f32 %v2158_v36, %v2339_v13 }
 0x13e   : > { %v1885_v27 = vpop.eup %1884  ;;  %1904 = vrcp.f32 %v1073_v5  ;;  %v1074_v28 = vadd.f32 1.0, %v1883_v21  ;;  %v1597_v4 = vmul.f32 -1.442695, %v2469_v49  ;;  %v1563_v15 = vmul.f32 -1.442695, %v2473_v56 }
 0x13f   : > { %v1887_v32 = vpop.eup %1886  ;;  %1906 = vrcp.f32 %v1105_v44  ;;  %v1106_v58 = vadd.f32 1.0, %v1885_v27  ;;  %v2495_v13 = vadd.f32 %v2327_v52, %v2158_v36  ;;  %v1566_v21 = vmul.f32 -1.442695, %v2486_v0 }
 0x140   : > { %v1889_v38 = vpop.eup %1888  ;;  %1908 = vrcp.f32 %v1074_v28  ;;  %v1077_v23 = vadd.f32 1.0, %v1887_v32  ;;  %v2505_v27 = vadd.f32 %v2158_v36, %v2353_v60 }
 0x141   : > { %v1891_v62 = vpop.eup %1890  ;;  %1910 = vrcp.f32 %v1106_v58  ;;  %v1296_v52 = vmul.f32 %v1889_v38, %v2295_v14 }
 0x142   : > { %v1893_v20 = vpop.eup %1892  ;;  %1912 = vrcp.f32 %v1076_v33  ;;  %v1075_v46 = vadd.f32 1.0, %v1891_v62  ;;  %v1264_v33 = vmul.f32 %v1881_v22, %v2273_v31 }
 0x143   : > { %v1895_v8 = vpop.eup %1894  ;;  %v1262_v59 = vmul.f32 %v1893_v20, %v2331_v17  ;;  %1914 = vrcp.f32 %v1077_v23  ;;  %v1565_v17 = vmul.f32 -1.442695, %v2465_v40  ;;  %v2640_v20 = vld [vmem:[#allocation4_spill] sm:$0xff] }
 0x144   : > { %v1897_v51 = vpop.eup %1896  ;;  %v1294_v34 = vmul.f32 %v1895_v8, %v2335_v7  ;;  %1916 = vrcp.f32 %v1075_v46  ;;  %v1595_v7 = vmul.f32 -1.442695, %v2477_v29  ;;  %v1598_v8 = vmul.f32 -1.442695, %v2505_v27 }
 0x145   : > { %v1899_v37 = vpop.eup %1898  ;;  %v1325_v1 = vadd.f32 %v1324_v57, %v1262_v59  ;;  %1918 = vpow2.f32 %v1591_v42  ;;  %v2499_v57 = vadd.f32 %v2337_v25, %v2158_v36  ;;  %v1108_v58 = vadd.f32 1.0, %v1897_v51 }
 0x146   : > { %v1901_v5 = vpop.eup %1900  ;;  %v1362_v10 = vadd.f32 %v1361_v30, %v1294_v34  ;;  %1920 = vpow2.f32 %v1564_v63  ;;  %v1109_v23 = vadd.f32 1.0, %v1899_v37  ;;  %v1568_v51 = vmul.f32 -1.442695, %v2495_v13 }
 0x147   : > { %v1903_v44 = vpop.eup %1902  ;;  %v1263_v11 = vmul.f32 %v1901_v5, %v2351_v53  ;;  %1922 = vpow2.f32 %v1596_v48  ;;  %v1600_v37 = vmul.f32 -1.442695, %v2499_v57 }
 0x148   : > { %v1905_v16 = vpop.eup %1904  ;;  %v1295_v30 = vmul.f32 %v1903_v44, %v2359_v61  ;;  %1924 = vpow2.f32 %v1562_v50 }
 0x149   : > { %v1907_v53 = vpop.eup %1906  ;;  %v1326_v28 = vadd.f32 %v1325_v1, %v1263_v11  ;;  %1926 = vpow2.f32 %v1594_v18  ;;  %v1265_v42 = vmul.f32 %v1905_v16, %v2343_v3 }
 0x14a   : > { %v1909_v32 = vpop.eup %1908  ;;  %v1363_v25 = vadd.f32 %v1362_v10, %v1295_v30  ;;  %1928 = vpow2.f32 %v1565_v17  ;;  %v1297_v46 = vmul.f32 %v1907_v53, %v2640_v20  ;;  %v2641_v17 = vld [vmem:[#allocation8_spill] sm:$0xff] }
 0x14b   : > { %v1911_v61 = vpop.eup %1910  ;;  %v1327_v62 = vadd.f32 %v1326_v28, %v1264_v33  ;;  %v1266_v63 = vmul.f32 %v1909_v32, %v2374_v12  ;;  %1930 = vpow2.f32 %v1597_v4  ;;  %v2642_v28 = vld [vmem:[#allocation5_spill] sm:$0xff] }
 0x14c   : > { %v1913_v60 = vpop.eup %1912  ;;  %v1364_v31 = vadd.f32 %v1363_v25, %v1296_v52  ;;  %v1298_v14 = vmul.f32 %v1911_v61, %v2385_v55  ;;  %1932 = vpow2.f32 %v1563_v15  ;;  %v2523_v32 = vadd.f32 %v2642_v28, %v2158_v36 }
 0x14d   : > { %v1915_v22 = vpop.eup %1914  ;;  %v1328_v38 = vadd.f32 %v1327_v62, %v1265_v42  ;;  %1934 = vpow2.f32 %v1595_v7  ;;  %v1268_v4 = vmul.f32 %v1913_v60, %v2641_v17  ;;  %v2644_v42 = vld [vmem:[#allocation7_spill] sm:$0xff] }
 0x14e   : > { %v1917_v59 = vpop.eup %1916  ;;  %1936 = vrcp.f32 %v1108_v58  ;;  %v1365_v48 = vadd.f32 %v1364_v31, %v1297_v46  ;;  %v1269_v15 = vmul.f32 %v1915_v22, %v2403_v54  ;;  %v2643_v54 = vld [vmem:[#allocation6_spill] sm:$0xff]  ;;  %v2531_v62 = vadd.f32 %v2158_v36, %v2644_v42  ;;  %v2645_v46 = vld [vmem:[#allocation9_spill] sm:$0xff] }
 0x14f   : > { %v1919_v3 = vpop.eup %1918  ;;  %v1329_v50 = vadd.f32 %v1328_v38, %v1266_v63  ;;  %1938 = vrcp.f32 %v1109_v23  ;;  %v1267_v12 = vmul.f32 %v1917_v59, %v2413_v2  ;;  %v2527_v25 = vadd.f32 %v2643_v54, %v2158_v36  ;;  %v2646_v22 = vld [vmem:[#allocation10_spill] sm:$0xff] }
 0x150   : > { %v1921_v34 = vpop.eup %1920  ;;  %v2516_v18 = vadd.f32 %v1365_v48, %v1298_v14  ;;  %v1107_v55 = vadd.f32 1.0, %v1919_v3  ;;  %1940 = vpow2.f32 %v1566_v21  ;;  %v2535_v31 = vadd.f32 %v2158_v36, %v2645_v46 }
 0x151   : > { %v1923_v1 = vpop.eup %1922  ;;  %v1330_v5 = vadd.f32 %v1329_v50, %v1267_v12  ;;  %1942 = vpow2.f32 %v1598_v8  ;;  %v1080_v44 = vadd.f32 1.0, %v1921_v34  ;;  %v2539_v38 = vadd.f32 %v2646_v22, %v2158_v36  ;;  %v2647_v8 = vld [vmem:[#allocation11_spill] sm:$0xff] }
 0x152   : > { %v1925_v10 = vpop.eup %1924  ;;  %1944 = vrcp.f32 %v1107_v55  ;;  %v1112_v30 = vadd.f32 1.0, %v1923_v1  ;;  %v2543_v59 = vadd.f32 %v2647_v8, %v2158_v36  ;;  %v2547_v3 = vadd.f32 %v2158_v36, %v2395_v6 }
 0x153   : > { %v1927_v7 = vpop.eup %1926  ;;  %v1331_v2 = vadd.f32 %v1330_v5, %v1268_v4  ;;  %v1078_v11 = vadd.f32 1.0, %v1925_v10  ;;  %1946 = vpow2.f32 %v1568_v51  ;;  %v1569_v51 = vmul.f32 -1.442695, %v2523_v32 }
 0x154   : > { %v1929_v16 = vpop.eup %1928  ;;  %v1110_v53 = vadd.f32 1.0, %v1927_v7  ;;  %1948 = vpow2.f32 %v1600_v37  ;;  %v1601_v34 = vmul.f32 -1.442695, %v2527_v25  ;;  %v1567_v1 = vmul.f32 -1.442695, %v2531_v62 }
 0x155   : > { %v1931_v33 = vpop.eup %1930  ;;  %1950 = vrcp.f32 %v1078_v11  ;;  %v1332_v21 = vadd.f32 %v1331_v2, %v1269_v15  ;;  %v1081_v23 = vadd.f32 1.0, %v1929_v16  ;;  %v1599_v17 = vmul.f32 -1.442695, %v2535_v31 }
 0x156   : > { %v1933_v52 = vpop.eup %1932  ;;  %1952 = vrcp.f32 %v1110_v53  ;;  %v1113_v60 = vadd.f32 1.0, %v1931_v33  ;;  %v1572_v6 = vmul.f32 -1.442695, %v2539_v38  ;;  %v1604_v10 = vmul.f32 -1.442695, %v2543_v59  ;;  %v2649_v53 = vld [vmem:[#allocation13_spill] sm:$0xff] }
 0x157   : > { %v1935_v58 = vpop.eup %1934  ;;  %1954 = vrcp.f32 %v1080_v44  ;;  %v1079_v61 = vadd.f32 1.0, %v1933_v52  ;;  %v1570_v7 = vmul.f32 -1.442695, %v2547_v3  ;;  %v2559_v2 = vadd.f32 %v2158_v36, %v2397_v39  ;;  %v2648_v44 = vld [vmem:[#allocation12_spill] sm:$0xff] }
 0x158   : > { %v1937_v63 = vpop.eup %1936  ;;  %1956 = vrcp.f32 %v1112_v30  ;;  %v1111_v20 = vadd.f32 1.0, %v1935_v58  ;;  %v2563_v11 = vadd.f32 %v2648_v44, %v2158_v36  ;;  %v2569_v33 = vadd.f32 %v2649_v53, %v2158_v36 }
 0x159   : > { %v1939_v14 = vpop.eup %1938  ;;  %1958 = vrcp.f32 %v1079_v61  ;;  %v2574_v39 = vadd.f32 %v2158_v36, %v2415_v35  ;;  %v2578_v54 = vadd.f32 %v2158_v36, %v2417_v43 }
 0x15a   : > { %v1941_v48 = vpop.eup %1940  ;;  %1960 = vrcp.f32 %v1111_v20  ;;  %v1573_v35 = vmul.f32 -1.442695, %v2563_v11  ;;  %v1605_v43 = vmul.f32 -1.442695, %v2569_v33 }
 0x15b   : > { %v1943_v50 = vpop.eup %1942  ;;  %1962 = vrcp.f32 %v1081_v23  ;;  %v1082_v12 = vadd.f32 1.0, %v1941_v48 }
 0x15c   : > { %v1945_v55 = vpop.eup %1944  ;;  %1964 = vrcp.f32 %v1113_v60  ;;  %v1114_v37 = vadd.f32 1.0, %v1943_v50 }
 0x15d   : > { %v1947_v4 = vpop.eup %1946  ;;  %v1299_v5 = vmul.f32 %v1945_v55, %v2443_v26  ;;  %1966 = vrcp.f32 %v1082_v12  ;;  %v1300_v26 = vmul.f32 %v1937_v63, %v2424_v24 }
 0x15e   : > { %v1949_v15 = vpop.eup %1948  ;;  %1968 = vrcp.f32 %v1114_v37  ;;  %v1084_v50 = vadd.f32 1.0, %v1947_v4 }
 0x15f   : > { %v1951_v16 = vpop.eup %1950  ;;  %v1367_v30 = vadd.f32 %v2516_v18, %v1299_v5  ;;  %1970 = vpow2.f32 %v1569_v51  ;;  %v1301_v18 = vmul.f32 %v1939_v14, %v2430_v45  ;;  %v1571_v45 = vmul.f32 -1.442695, %v2574_v39 }
 0x160   : > { %v1953_v52 = vpop.eup %1952  ;;  %v1270_v28 = vmul.f32 %v1951_v16, %v2455_v41  ;;  %1972 = vpow2.f32 %v1601_v34  ;;  %v1602_v41 = vmul.f32 -1.442695, %v2559_v2  ;;  %v1603_v14 = vmul.f32 -1.442695, %v2578_v54 }
 0x161   : > { %v1955_v24 = vpop.eup %1954  ;;  %v1368_v58 = vadd.f32 %v1367_v30, %v1300_v26  ;;  %v1302_v23 = vmul.f32 %v1953_v52, %v2460_v19  ;;  %1974 = vpow2.f32 %v1567_v1  ;;  %v1116_v34 = vadd.f32 1.0, %v1949_v15 }
 0x162   : > { %v1957_v61 = vpop.eup %1956  ;;  %v1333_v42 = vadd.f32 %v1332_v21, %v1270_v28  ;;  %1976 = vpow2.f32 %v1599_v17  ;;  %v1272_v8 = vmul.f32 %v1955_v24, %v2447_v47 }
 0x163   : > { %v1959_v63 = vpop.eup %1958  ;;  %v1369_v60 = vadd.f32 %v1368_v58, %v1301_v18  ;;  %1978 = vpow2.f32 %v1572_v6 }
 0x164   : > { %v1961_v20 = vpop.eup %1960  ;;  %v1271_v36 = vmul.f32 %v1959_v63, %v2473_v56  ;;  %1980 = vpow2.f32 %v1604_v10  ;;  %v1304_v56 = vmul.f32 %v1957_v61, %v2451_v9 }
 0x165   : > { %v1963_v19 = vpop.eup %1962  ;;  %v1370_v46 = vadd.f32 %v1369_v60, %v1302_v23  ;;  %v1303_v21 = vmul.f32 %v1961_v20, %v2477_v29  ;;  %1982 = vpow2.f32 %v1570_v7 }
 0x166   : > { %v1965_v22 = vpop.eup %1964  ;;  %v1334_v48 = vadd.f32 %v1333_v42, %v1271_v36  ;;  %1984 = vpow2.f32 %v1602_v41  ;;  %v1273_v37 = vmul.f32 %v1963_v19, %v2465_v40 }
 0x167   : > { %v1967_v12 = vpop.eup %1966  ;;  %v1371_v51 = vadd.f32 %v1370_v46, %v1303_v21  ;;  %1986 = vpow2.f32 %v1573_v35  ;;  %v1305_v5 = vmul.f32 %v1965_v22, %v2469_v49 }
 0x168   : > { %v1969_v55 = vpop.eup %1968  ;;  %v1335_v1 = vadd.f32 %v1334_v48, %v1272_v8  ;;  %v1274_v29 = vmul.f32 %v1967_v12, %v2486_v0  ;;  %1988 = vpow2.f32 %v1605_v43 }
 0x169   : > { %v1971_v17 = vpop.eup %1970  ;;  %v1372_v47 = vadd.f32 %v1371_v51, %v1304_v56  ;;  %v1306_v4 = vmul.f32 %v1969_v55, %v2505_v27  ;;  %1990 = vpow2.f32 %v1571_v45 }
 0x16a   : > { %v1973_v6 = vpop.eup %1972  ;;  %v1336_v10 = vadd.f32 %v1335_v1, %v1273_v37  ;;  %1992 = vpow2.f32 %v1603_v14  ;;  %v1085_v40 = vadd.f32 1.0, %v1971_v17 }
 0x16b   : > { %v1975_v9 = vpop.eup %1974  ;;  %v1373_v15 = vadd.f32 %v1372_v47, %v1305_v5  ;;  %1994 = vrcp.f32 %v1084_v50  ;;  %v1117_v30 = vadd.f32 1.0, %v1973_v6 }
 0x16c   : > { %v1977_v7 = vpop.eup %1976  ;;  %v1337_v44 = vadd.f32 %v1336_v10, %v1274_v29  ;;  %v1083_v16 = vadd.f32 1.0, %v1975_v9  ;;  %1996 = vrcp.f32 %v1116_v34 }
 0x16d   : > { %v1979_v26 = vpop.eup %1978  ;;  %v1374_v0 = vadd.f32 %v1373_v15, %v1306_v4  ;;  %v1115_v53 = vadd.f32 1.0, %v1977_v7 }
 0x16e   : > { %v1981_v49 = vpop.eup %1980  ;;  %1998 = vrcp.f32 %v1083_v16  ;;  %v1088_v28 = vadd.f32 1.0, %v1979_v26 }
 0x16f   : > { %v1983_v52 = vpop.eup %1982  ;;  %2000 = vrcp.f32 %v1115_v53  ;;  %v1120_v58 = vadd.f32 1.0, %v1981_v49 }
 0x170   : > { %v1985_v27 = vpop.eup %1984  ;;  %2002 = vrcp.f32 %v1085_v40  ;;  %v1086_v24 = vadd.f32 1.0, %v1983_v52 }
 0x171   : > { %v1987_v18 = vpop.eup %1986  ;;  %2004 = vrcp.f32 %v1117_v30  ;;  %v1118_v23 = vadd.f32 1.0, %v1985_v27 }
 0x172   : > { %v1989_v61 = vpop.eup %1988  ;;  %2006 = vrcp.f32 %v1086_v24  ;;  %v1089_v63 = vadd.f32 1.0, %v1987_v18 }
 0x173   : > { %v1991_v42 = vpop.eup %1990  ;;  %2008 = vrcp.f32 %v1118_v23  ;;  %v1121_v35 = vadd.f32 1.0, %v1989_v61 }
 0x174   : > { %v1993_v41 = vpop.eup %1992  ;;  %2010 = vrcp.f32 %v1088_v28  ;;  %v1087_v60 = vadd.f32 1.0, %v1991_v42 }
 0x175   : > { %2012 = vrcp.f32 %v1120_v58  ;;  %v1119_v20 = vadd.f32 1.0, %v1993_v41  ;;  %v1995_v36 = vpop.eup %1994 }
 0x176   : > { %2014 = vrcp.f32 %v1087_v60  ;;  %v1997_v43 = vpop.eup %1996  ;;  %v1276_v8 = vmul.f32 %v1995_v36, %v2495_v13 }
 0x177   : > { %2016 = vrcp.f32 %v1119_v20  ;;  %v1308_v12 = vmul.f32 %v1997_v43, %v2499_v57 }
 0x178   : > { %v1999_v45 = vpop.eup %1998  ;;  %2018 = vrcp.f32 %v1089_v63 }
 0x179   : > { %v2001_v19 = vpop.eup %2000  ;;  %v1275_v46 = vmul.f32 %v1999_v45, %v2531_v62  ;;  %2020 = vrcp.f32 %v1121_v35  ;;  %v1409_v35 = vstv %s1408_s10 }
 0x17a   : > { %v2003_v21 = vpop.eup %2002  ;;  %v1307_v14 = vmul.f32 %v2001_v19, %v2535_v31 }
 0x17b   : > { %v2005_v22 = vpop.eup %2004  ;;  %v1338_v48 = vadd.f32 %v1337_v44, %v1275_v46  ;;  %v1277_v34 = vmul.f32 %v2003_v21, %v2523_v32 }
 0x17c   : > { %v2007_v50 = vpop.eup %2006  ;;  %v1375_v56 = vadd.f32 %v1374_v0, %v1307_v14  ;;  %v1309_v62 = vmul.f32 %v2005_v22, %v2527_v25 }
 0x17d   : > { %v2009_v51 = vpop.eup %2008  ;;  %v1339_v55 = vadd.f32 %v1338_v48, %v1276_v8  ;;  %v1278_v37 = vmul.f32 %v2007_v50, %v2547_v3 }
 0x17e   : > { %v2011_v1 = vpop.eup %2010  ;;  %v1376_v29 = vadd.f32 %v1375_v56, %v1308_v12  ;;  %v1310_v31 = vmul.f32 %v2009_v51, %v2559_v2 }
 0x17f   : > { %v2013_v17 = vpop.eup %2012  ;;  %v1340_v5 = vadd.f32 %v1339_v55, %v1277_v34  ;;  %v1280_v3 = vmul.f32 %v2011_v1, %v2539_v38 }
 0x180   : > { %v2015_v13 = vpop.eup %2014  ;;  %v1377_v47 = vadd.f32 %v1376_v29, %v1309_v62  ;;  %v1312_v25 = vmul.f32 %v2013_v17, %v2543_v59 }
 0x181   : > { %v2017_v4 = vpop.eup %2016  ;;  %v1341_v6 = vadd.f32 %v1340_v5, %v1278_v37  ;;  %v1279_v57 = vmul.f32 %v2015_v13, %v2574_v39 }
 0x182   : > { %v2019_v10 = vpop.eup %2018  ;;  %v1378_v9 = vadd.f32 %v1377_v47, %v1310_v31  ;;  %v1311_v32 = vmul.f32 %v2017_v4, %v2578_v54 }
 0x183   : > { %v2021_v15 = vpop.eup %2020  ;;  %v1342_v7 = vadd.f32 %v1341_v6, %v1279_v57  ;;  %v1281_v2 = vmul.f32 %v2019_v10, %v2563_v11  ;;  %v1606_v11 = vld [vmem:[%s2623_s3] ss:$0 sm:$0xff] }
 0x184   : > { %v1379_v44 = vadd.f32 %v1378_v9, %v1311_v32  ;;  %v1313_v16 = vmul.f32 %v2021_v15, %v2569_v33 }
 0x185   : > { %v1343_v40 = vadd.f32 %v1342_v7, %v1280_v3 }
 0x186   : > { %v1380_v26 = vadd.f32 %v1379_v44, %v1312_v25 }
 0x187   : > { %v1344_v0 = vadd.f32 %v1343_v40, %v1281_v2 }
 0x188   : > { %v1381_v30 = vadd.f32 %v1380_v26, %v1313_v16 }
 0x189   : > { %v1345_v39 = vrot.slane %v1344_v0, 4 }
 0x18a   : > { %v1382_v53 = vrot.slane %v1381_v30, 4 }
 0x18b   : > { %v1346_v49 = vadd.f32 %v1345_v39, %v1344_v0 }
 0x18c   : > { %v1383_v52 = vadd.f32 %v1382_v53, %v1381_v30 }
 0x18d   : > { %v1347_v54 = vrot.slane %v1346_v49, 2 }
 0x18e   : > { %v1384_v27 = vrot.slane %v1383_v52, 2 }
 0x18f   : > { %v1348_v28 = vadd.f32 %v1347_v54, %v1346_v49 }
 0x190   : > { %v1385_v38 = vadd.f32 %v1384_v27, %v1383_v52 }
 0x191   : > { %v1349_v24 = vrot.slane %v1348_v28, 1 }
 0x192   : > { %v1386_v59 = vrot.slane %v1385_v38, 1 }
 0x193   : > { %v1350_v18 = vadd.f32 %v1349_v24, %v1348_v28 }
 0x194   : > { %v1387_v58 = vadd.f32 %v1386_v59, %v1385_v38 }
 0x195   : > { %v1388_v33 = vmul.f32 0.00390625, %v1350_v18 }
 0x196   : > { %v1389_v23 = vmul.f32 0.00390625, %v1387_v58 }
 0x197   : > { %v1397_v42 = vmul.f32 %v1606_v11, %v1388_v33 }
 0x198   : > { %v1398_v61 = vmul.f32 %v1606_v11, %v1389_v23 }
 0x19a   : > { %v1401_v41 = vrot.slane %v1398_v61, 7 }
 0x19c   : > { %v1403_v63 = vsel %vm1402_vm2, %v1401_v41, %v1397_v42 }
 0x19d   : > { %v1405_v60 = vsel %vm573_vm0, %v1403_v63, 0.0 }
 0x19e   : > { %1406 = vadd.xlane.f32.xlu0 %v1405_v60 }
 0x22b   : > { %v1407_v20 = vpop.xlane.xlu0 %1406 }
 0x22c   : > { %v1410_v36 = vadd.f32 %v1409_v35, %v1407_v20 }
 0x22e   : > { %1412 = vst.msk [vmem:[%s223_s14] sm:$0x3] %vm1411_vm3, %v1410_v36 }
 0x22f PF: > { %s16_s20 = sadd.s32 1, %s2028_s20  }
 0x230   : > { %p13_p4 = scmp.ge.s32.totalorder %s16_s20, 4  }
 0x232   :  { %15 = sbr.rel (!%p13_p4) target bundleno = 2 (0x2), region = 70 }

</bundles_post_ra>
